<compile_context>
chip_gen: v5e
topology: v5e:2x2
jax: 0.10.0
libtpu: 0.0.40
codegen_flags: <defaults>
</compile_context>

<pallas_src>
import functools

import jax
import jax.numpy as jnp
from jax.experimental import pallas as pl
from jax.experimental.pallas import tpu as pltpu


def _sigmoid_kernel(x_ref, o_ref):
    x = x_ref[...].astype(jnp.float32)
    # sigmoid(x) = 0.5 * tanh(0.5 * x) + 0.5  -> single EUP transcendental.
    o_ref[...] = (0.5 * jnp.tanh(0.5 * x) + 0.5).astype(o_ref.dtype)


_LANE_CANDIDATES = (4096, 2048, 1024, 512, 256, 128)
_MIN_PIPELINE_BYTES = 2 * 1024 * 1024      # below this, one block is fine
_MAX_RAGGED_LANE_BYTES = 8 * 1024 * 1024   # ragged-lane fast path size cap


@functools.lru_cache(maxsize=1)
def _tpu_hints():
    """(target_block_bytes, min_grid_steps, vmem_capacity_bytes)."""
    block = 4 * 1024 * 1024
    min_steps = 4
    vmem_cap = 128 * 1024 * 1024
    try:
        info = pltpu.get_tpu_info()
        vmem_cap = int(info.vmem_capacity_bytes)
        if vmem_cap <= 64 * 1024 * 1024:
            # v7x: 64 MiB VMEM per TC, 2 TCs, 3.2 TB/s HBM -> bigger blocks and
            # more grid steps so both cores stay fed.
            block = 8 * 1024 * 1024
            min_steps = 8
    except Exception:  # pragma: no cover - fall back to conservative defaults
        pass
    return block, min_steps, vmem_cap


def sigmoid_pallas(x):
    """Elementwise sigmoid over an arbitrarily-shaped array."""
    orig_shape = x.shape
    dtype = x.dtype
    n = x.size
    if n == 0:
        return x

    itemsize = jnp.dtype(dtype).itemsize
    pack = max(8, 32 // itemsize)  # sublane pack: 8 f32, 16 bf16, 32 int8/fp8
    target_block_bytes, min_steps, vmem_cap = _tpu_hints()

    # ---- choose a 2-D (rows, lanes) layout, copy-free whenever possible ----
    lanes = None
    for cand in _LANE_CANDIDATES:
        if n % cand == 0:
            lanes = cand
            break

    pad = 0
    if lanes is not None:
        x2d = x.reshape(n // lanes, lanes)
    else:
        # Ragged total size: use the original trailing dim as the lane axis.
        # Full-extent last-dim blocks are legal for any width, so this avoids
        # the pad + output-slice HBM round trips (stores are masked instead).
        last = orig_shape[-1] if x.ndim else 1
        if 0 < last * itemsize <= _MAX_RAGGED_LANE_BYTES:
            lanes = last
            x2d = x.reshape(n // lanes, lanes)
        else:
            # Pathological huge ragged trailing dim: pad to 128 lanes.
            lanes = 128
            pad = (-n) % lanes
            x2d = jnp.pad(x.reshape(-1), (0, pad)).reshape(-1, lanes)

    rows = x2d.shape[0]
    total_bytes = rows * lanes * itemsize

    # ---- block sizing: big lane-dense blocks, but never a degenerate grid ---
    target_rows = max(pack, (target_block_bytes // (lanes * itemsize)) // pack * pack)
    if total_bytes > _MIN_PIPELINE_BYTES and rows > pack:
        # Guarantee >= min_steps grid steps so the pipeline double-buffers and
        # (on v7x) both TensorCores get a share of the row axis.
        steps_cap_rows = -(-rows // min_steps)                    # ceil
        steps_cap_rows = max(pack, -(-steps_cap_rows // pack) * pack)
        block_rows = min(target_rows, steps_cap_rows)
    else:
        block_rows = target_rows
    block_rows = min(block_rows, rows)  # full-extent block for tiny row counts
    grid = (-(-rows // block_rows),)    # ragged last block is masked by Pallas

    block_bytes = block_rows * lanes * itemsize
    # Double-buffered input + output ~= 4x block; keep explicit headroom and
    # stay well inside physical VMEM (important on v5e: 16 MiB default limit).
    vmem_limit = max(16 << 20, 5 * block_bytes)
    vmem_limit = int(min(vmem_limit, 48 << 20, max(16 << 20, vmem_cap - (8 << 20))))

    cost = pl.CostEstimate(
        flops=5 * n,
        transcendentals=n,
        bytes_accessed=2 * n * itemsize,
    )

    out2d = pl.pallas_call(
        _sigmoid_kernel,
        out_shape=jax.ShapeDtypeStruct((rows, lanes), dtype),
        grid_spec=pltpu.PrefetchScalarGridSpec(
            num_scalar_prefetch=0,
            grid=grid,
            in_specs=[pl.BlockSpec((block_rows, lanes), lambda i: (i, 0))],
            out_specs=pl.BlockSpec((block_rows, lanes), lambda i: (i, 0)),
        ),
        compiler_params=pltpu.CompilerParams(
            dimension_semantics=("parallel",),
            vmem_limit_bytes=vmem_limit,
        ),
        cost_estimate=cost,
    )(x2d)

    if pad:
        return out2d.reshape(-1)[:n].reshape(orig_shape)
    return out2d.reshape(orig_shape)


if __name__ == "__main__":
    key = jax.random.PRNGKey(0)
    k0, k1, k2 = jax.random.split(key, 3)

    # Primary shape consistent with the NCHW test module input.
    x = jax.random.normal(k0, (2, 4, 16, 16), dtype=jnp.float32) * 3.0
    out = jax.block_until_ready(sigmoid_pallas(x))
    ref = jax.nn.sigmoid(x)
    assert out.shape == x.shape and out.dtype == x.dtype
    assert jnp.allclose(out, ref, atol=1e-5, rtol=1e-5), "mismatch vs reference"

    # Ragged-size path (no-pad ragged-lane fast path).
    xr = jax.random.normal(k1, (3, 5, 7), dtype=jnp.float32) * 3.0
    outr = jax.block_until_ready(sigmoid_pallas(xr))
    assert outr.shape == xr.shape
    assert jnp.allclose(outr, jax.nn.sigmoid(xr), atol=1e-5, rtol=1e-5)

    # Larger input (exercises the multi-step pipelined grid).
    xl = jax.random.normal(k2, (8, 64, 64, 64), dtype=jnp.float32) * 3.0
    outl = jax.block_until_ready(sigmoid_pallas(xl))
    assert jnp.allclose(outl, jax.nn.sigmoid(xl), atol=1e-5, rtol=1e-5)

    print("KERNEL_OK")
</pallas_src>

<mosaic_0001>
module attributes {stable_mosaic.version = 11 : i64} {
  func.func @_sigmoid_kernel(%arg0: i32, %arg1: memref<1x2048xf32, #tpu.memory_space<vmem>>, %arg2: memref<1x2048xf32, #tpu.memory_space<vmem>>) attributes {dimension_semantics = [#tpu.dimension_semantics<parallel>], iteration_bounds = array<i64: 1>, scalar_prefetch = 0 : i64, scratch_operands = 0 : i64, tpu.core_type = #tpu.core_type<tc>, window_params = [{transform_indices = @transform_0, window_bounds = array<i64: 1, 2048>}, {transform_indices = @transform_1, window_bounds = array<i64: 1, 2048>}]} {
    %c0 = arith.constant 0 : index
    %c0_0 = arith.constant 0 : index
    %0 = vector.load %arg1[%c0, %c0_0] : memref<1x2048xf32, #tpu.memory_space<vmem>>, vector<1x2048xf32>
    %cst = arith.constant 5.000000e-01 : f32
    %1 = vector.broadcast %cst : f32 to vector<1x2048xf32>
    %2 = arith.mulf %1, %0 : vector<1x2048xf32>
    %3 = math.tanh %2 : vector<1x2048xf32>
    %cst_1 = arith.constant 5.000000e-01 : f32
    %4 = vector.broadcast %cst_1 : f32 to vector<1x2048xf32>
    %5 = arith.mulf %4, %3 : vector<1x2048xf32>
    %cst_2 = arith.constant 5.000000e-01 : f32
    %6 = vector.broadcast %cst_2 : f32 to vector<1x2048xf32>
    %7 = arith.addf %5, %6 : vector<1x2048xf32>
    %c0_3 = arith.constant 0 : index
    %c0_4 = arith.constant 0 : index
    %8 = vector.load %arg2[%c0_3, %c0_4] : memref<1x2048xf32, #tpu.memory_space<vmem>>, vector<1x2048xf32>
    tpu.vector_store %arg2[%c0_3, %c0_4], %7 {strides = array<i32>} : memref<1x2048xf32, #tpu.memory_space<vmem>>, vector<1x2048xf32>,
    return
  }
  func.func @transform_0(%arg0: i32) -> (i32, i32) {
    %c0_i32 = arith.constant 0 : i32
    %c0_i32_0 = arith.constant 0 : i32
    return %arg0, %c0_i32 : i32, i32
  }
  func.func @transform_1(%arg0: i32) -> (i32, i32) {
    %c0_i32 = arith.constant 0 : i32
    %c0_i32_0 = arith.constant 0 : i32
    return %arg0, %c0_i32 : i32, i32
  }
}

</mosaic_0001>

<bundles_post_ra>
// kernel: tpu_custom_call.1
= control target key start
LH: loop header
LB: loop body
LE: loop exit
PB: predicated region body
PF: predicated region fallthrough
CT: control target
= control target key end

     0   :  { %6 = vsyncpa [#allocation3], 0  ;;  %s128_s0 = inlined_call_operand.hbm [shape: f32[1,2048], index: 0, kind: input, shape index: {}]   ;;  %s129_s1 = inlined_call_operand.hbm [shape: f32[1,2048], index: 1, kind: output, shape index: {}]  }
   0x1   :  { %7 = vsyncpa [#allocation4], 0  ;;  %s13_s8 = sshll.u32 %s128_s0, 4  ;;  %s110_s9 = smov [#allocation2]   ;;  %s14_s8 = int_to_ptr.hbm [resolvable:$true] %s13_s8 }
   0x2   :  { %s15_s10 = sshll.u32 %s110_s9, 4  ;;  %s16_s10 = int_to_ptr.vmem [resolvable:$true] %s15_s10 }
   0x3   :  { %18 = dma.hbm_to_vmem [thread:$0]  %s14_s8, 256, %s16_s10, [#allocation3]  }
   0x4   :  { %106 = dma.done.wait [#allocation3], 256  }
   0x5   :  { %107 = vsyncadd [#allocation3], 4294967040  ;;  %v23_v0 = vld [vmem:[#allocation2] sm:$0xff]  ;;  %v24_v1 = vld [vmem:[#allocation2 + $0x8] sm:$0xff]  ;;  %s111_s11 = smov [#allocation5]   ;;  %s42_s14 = sshll.u32 %s129_s1, 4  ;;  %s43_s14 = int_to_ptr.hbm [resolvable:$true] %s42_s14 }
   0x6   :  { %v25_v2 = vmul.f32 0.5, %v23_v0  ;;  %v26_v3 = vmul.f32 0.5, %v24_v1  ;;  %s40_s12 = sshll.u32 %s111_s11, 4  ;;  %s41_s12 = int_to_ptr.vmem [resolvable:$true] %s40_s12 }
   0x8   :  { %54 = vtanh.f32 %v25_v2 }
   0x9   :  { %56 = vtanh.f32 %v26_v3 }
   0xe   :  { %v55_v4 = vpop.eup %54 }
   0xf   :  { %v57_v5 = vpop.eup %56  ;;  %v29_v6 = vmul.f32 0.5, %v55_v4 }
  0x10   :  { %v30_v7 = vmul.f32 0.5, %v57_v5 }
  0x11   :  { %v31_v8 = vadd.f32 0.5, %v29_v6 }
  0x12   :  { %v32_v9 = vadd.f32 0.5, %v30_v7 }
  0x13   :  { %33 = vst [vmem:[#allocation5] sm:$0xff] %v31_v8 }
  0x14   :  { %34 = vst [vmem:[#allocation5 + $0x8] sm:$0xff] %v32_v9 }
  0x15   :  { %45 = dma.vmem_to_hbm [thread:$0]  %s41_s12, 256, %s43_s14, [#allocation4]  }
  0x16   :  { %108 = dma.done.wait [#allocation4], 256  }
  0x17   :  { %109 = vsyncadd [#allocation4], 4294967040 }
  0x18   :  { %50 = vsyncpa [#allocation3], 1 }
  0x19   :  { %51 = vsyncpa [#allocation4], 1 }

</bundles_post_ra>
